<compile_context>
chip_gen: v7x
topology: tpu7x:2x2x1
jax: 0.10.0
libtpu: 0.0.40
codegen_flags: <defaults>
</compile_context>

<pallas_src>
import jax
import jax.numpy as jnp
import numpy as np
from jax.experimental import pallas as pl
from jax.experimental.pallas import tpu as pltpu

MAX_TILE_B = 1024   # rows per grid step; total VMEM use stays ~3 MiB
MIN_TILE_B = 16     # bf16 sublane pack: keep batch tiles (16, ...)-friendly


def _round_up(x, m):
    return ((x + m - 1) // m) * m


def _dqn_kernel(x_ref, w1_ref, b1_ref, w2_ref, b2_ref, w3_ref, b3_ref, out_ref):
    """One batch tile of the 3-layer MLP.

    x arrives as an f32 tile straight from HBM; the bf16 cast happens here.
    Weights are VMEM-resident bf16, matmuls accumulate in f32 on the MXU,
    bias + ReLU epilogues are f32 on the VPU.  The output block is only
    n_actions lanes wide, so HBM writeback is tiny.
    """
    x = x_ref[...].astype(jnp.bfloat16)

    h1 = jnp.dot(x, w1_ref[...], preferred_element_type=jnp.float32) + b1_ref[...]
    h1 = jnp.maximum(h1, 0.0).astype(jnp.bfloat16)

    h2 = jnp.dot(h1, w2_ref[...], preferred_element_type=jnp.float32) + b2_ref[...]
    h2 = jnp.maximum(h2, 0.0).astype(jnp.bfloat16)

    out_ref[...] = (jnp.dot(h2, w3_ref[...], preferred_element_type=jnp.float32)
                    + b3_ref[...])


def _choose_tile_b(batch):
    """Largest tile that bounds batch-padding waste to < one sublane group and
    keeps >= 2 grid steps for moderate batches (v7x dual-TC sharding)."""
    n_tiles = pl.cdiv(batch, MAX_TILE_B)
    if n_tiles == 1 and batch >= 2 * MIN_TILE_B:
        n_tiles = 2
    return min(MAX_TILE_B, _round_up(pl.cdiv(batch, n_tiles), MIN_TILE_B))


@jax.jit
def _dqn_pallas(x, w1, b1, w2, b2, w3, b3):
    """x: [B, d_in] float32.  Returns Q-values [B, n_actions] float32."""
    B, d_in = x.shape
    n_actions = w3.shape[1]
    tile_b = _choose_tile_b(B)

    def const_spec(a):
        # Constant block index -> DMA'd once, stays VMEM-resident across grid.
        return pl.BlockSpec(a.shape, lambda i: (0, 0))

    return pl.pallas_call(
        _dqn_kernel,
        out_shape=jax.ShapeDtypeStruct((B, n_actions), jnp.float32),
        grid=(pl.cdiv(B, tile_b),),
        in_specs=[
            pl.BlockSpec((tile_b, d_in), lambda i: (i, 0)),   # batch-streamed x
            const_spec(w1), const_spec(b1),
            const_spec(w2), const_spec(b2),
            const_spec(w3), const_spec(b3),
        ],
        # Only the n_actions valid lanes leave the chip; the ragged last batch
        # tile is masked on writeback, so no post-kernel slice is needed.
        out_specs=pl.BlockSpec((tile_b, n_actions), lambda i: (i, 0)),
        compiler_params=pltpu.CompilerParams(
            dimension_semantics=("parallel",),
        ),
    )(x, w1, b1, w2, b2, w3, b3)


def dqn_forward(cpu_usage, bandwidth_usage, slice_info, kparams):
    """Batched DQN forward matching the PyTorch module:
    cat([cpu, bw, slice], -1) -> fc1 -> ReLU -> fc2 -> ReLU -> fc3."""
    # TODO(synk): the dict/tuple -> tensor flattening in the torch forward is
    # host-side Python glue; the three feature arrays are consumed directly.
    cpu_usage = jnp.atleast_2d(cpu_usage)
    bandwidth_usage = jnp.atleast_2d(bandwidth_usage)
    slice_info = jnp.atleast_2d(slice_info)
    x = jnp.concatenate([cpu_usage, bandwidth_usage, slice_info],
                        axis=-1).astype(jnp.float32)
    return _dqn_pallas(x, kparams["w1"], kparams["b1"], kparams["w2"],
                       kparams["b2"], kparams["w3"], kparams["b3"])


def init_dqn_params(key, input_shape, n_actions, hidden=128):
    """PyTorch nn.Linear-style init: U(-1/sqrt(fan_in), 1/sqrt(fan_in)).
    Weights stored transposed as [in, out]; biases as [1, out]."""
    n_nodes, n_edges = input_shape
    d_in = n_nodes + n_edges + 5
    dims = [(d_in, hidden), (hidden, hidden), (hidden, n_actions)]
    params = {}
    for i, (fan_in, fan_out) in enumerate(dims, start=1):
        key, kw, kb = jax.random.split(key, 3)
        bound = 1.0 / np.sqrt(fan_in)
        params[f"w{i}"] = jax.random.uniform(
            kw, (fan_in, fan_out), jnp.float32, -bound, bound)
        params[f"b{i}"] = jax.random.uniform(
            kb, (1, fan_out), jnp.float32, -bound, bound)
    return params


def prepare_params(params):
    """Kernel-side layout: weights [in, out] bf16, biases [1, out] f32.
    No fc1 split and no lane padding -- w3 stays [hidden, n_actions]."""
    return {
        "w1": params["w1"].astype(jnp.bfloat16),
        "b1": params["b1"].astype(jnp.float32),
        "w2": params["w2"].astype(jnp.bfloat16),
        "b2": params["b2"].astype(jnp.float32),
        "w3": params["w3"].astype(jnp.bfloat16),
        "b3": params["b3"].astype(jnp.float32),
    }


def _reference_forward(cpu, bw, sl, params):
    """Pure-JAX f32 reference matching the PyTorch module."""
    x = jnp.concatenate([cpu, bw, sl], axis=-1)
    h1 = jnp.maximum(x @ params["w1"] + params["b1"], 0.0)
    h2 = jnp.maximum(h1 @ params["w2"] + params["b2"], 0.0)
    return h2 @ params["w3"] + params["b3"]


if __name__ == "__main__":
    # Small, DQN-consistent shapes: topology with 8 nodes / 12 edges,
    # 4 actions, batch of 2 states.
    n_nodes, n_edges, n_actions, batch = 8, 12, 4, 2

    key = jax.random.PRNGKey(0)
    key, kx = jax.random.split(key)
    params = init_dqn_params(key, (n_nodes, n_edges), n_actions)
    kparams = prepare_params(params)

    cpu_usage = jax.random.uniform(jax.random.fold_in(kx, 0), (batch, n_nodes),
                                   dtype=jnp.float32)
    bw_usage = jax.random.uniform(jax.random.fold_in(kx, 1), (batch, n_edges),
                                  dtype=jnp.float32)
    slice_info = jax.random.uniform(jax.random.fold_in(kx, 2), (batch, 5),
                                    dtype=jnp.float32)

    out = dqn_forward(cpu_usage, bw_usage, slice_info, kparams)
    jax.block_until_ready(out)

    ref = _reference_forward(cpu_usage, bw_usage, slice_info, params)
    # bf16 weights/activations with f32 accumulation -> looser tolerance.
    np.testing.assert_allclose(np.asarray(out), np.asarray(ref),
                               rtol=2e-2, atol=2e-2)
    assert out.shape == (batch, n_actions)

    print("KERNEL_OK")
</pallas_src>

<mosaic_0001>
module attributes {stable_mosaic.version = 11 : i64} {
  func.func @_dqn_kernel(%arg0: i32, %arg1: memref<16x25xf32, #tpu.memory_space<vmem>>, %arg2: memref<25x128xbf16, #tpu.memory_space<vmem>>, %arg3: memref<1x128xf32, #tpu.memory_space<vmem>>, %arg4: memref<128x128xbf16, #tpu.memory_space<vmem>>, %arg5: memref<1x128xf32, #tpu.memory_space<vmem>>, %arg6: memref<128x4xbf16, #tpu.memory_space<vmem>>, %arg7: memref<1x4xf32, #tpu.memory_space<vmem>>, %arg8: memref<16x4xf32, #tpu.memory_space<vmem>>) attributes {dimension_semantics = [#tpu.dimension_semantics<parallel>], iteration_bounds = array<i64: 1>, scalar_prefetch = 0 : i64, scratch_operands = 0 : i64, tpu.core_type = #tpu.core_type<tc>, window_params = [{transform_indices = @transform_0, window_bounds = array<i64: 16, 25>}, {pipeline_mode = #tpu.pipeline_mode<synchronous>, transform_indices = @transform_1, window_bounds = array<i64: 25, 128>}, {pipeline_mode = #tpu.pipeline_mode<synchronous>, transform_indices = @transform_2, window_bounds = array<i64: 1, 128>}, {pipeline_mode = #tpu.pipeline_mode<synchronous>, transform_indices = @transform_3, window_bounds = array<i64: 128, 128>}, {pipeline_mode = #tpu.pipeline_mode<synchronous>, transform_indices = @transform_4, window_bounds = array<i64: 1, 128>}, {pipeline_mode = #tpu.pipeline_mode<synchronous>, transform_indices = @transform_5, window_bounds = array<i64: 128, 4>}, {pipeline_mode = #tpu.pipeline_mode<synchronous>, transform_indices = @transform_6, window_bounds = array<i64: 1, 4>}, {transform_indices = @transform_7, window_bounds = array<i64: 16, 4>}]} {
    %c0 = arith.constant 0 : index
    %c0_0 = arith.constant 0 : index
    %0 = vector.load %arg1[%c0, %c0_0] : memref<16x25xf32, #tpu.memory_space<vmem>>, vector<16x25xf32>
    %1 = arith.truncf %0 : vector<16x25xf32> to vector<16x25xbf16>
    %c0_1 = arith.constant 0 : index
    %c0_2 = arith.constant 0 : index
    %2 = vector.load %arg2[%c0_1, %c0_2] : memref<25x128xbf16, #tpu.memory_space<vmem>>, vector<25x128xbf16>
    %cst = arith.constant dense<0.000000e+00> : vector<16x128xf32>
    %3 = tpu.matmul %1, %2, %cst {dimension_numbers = #tpu.dot_dimension_numbers<[1], [0], [0], [1], [0, 0, 1, 1], [], []>} : vector<16x25xbf16>, vector<25x128xbf16>, vector<16x128xf32> -> vector<16x128xf32>
    %c0_3 = arith.constant 0 : index
    %c0_4 = arith.constant 0 : index
    %4 = vector.load %arg3[%c0_3, %c0_4] : memref<1x128xf32, #tpu.memory_space<vmem>>, vector<1x128xf32>
    %5 = vector.broadcast %4 : vector<1x128xf32> to vector<16x128xf32>
    %6 = arith.addf %3, %5 : vector<16x128xf32>
    %cst_5 = arith.constant 0.000000e+00 : f32
    %7 = vector.broadcast %cst_5 : f32 to vector<16x128xf32>
    %8 = arith.maximumf %6, %7 : vector<16x128xf32>
    %9 = arith.truncf %8 : vector<16x128xf32> to vector<16x128xbf16>
    %c0_6 = arith.constant 0 : index
    %c0_7 = arith.constant 0 : index
    %10 = vector.load %arg4[%c0_6, %c0_7] : memref<128x128xbf16, #tpu.memory_space<vmem>>, vector<128x128xbf16>
    %cst_8 = arith.constant dense<0.000000e+00> : vector<16x128xf32>
    %11 = tpu.matmul %9, %10, %cst_8 {dimension_numbers = #tpu.dot_dimension_numbers<[1], [0], [0], [1], [0, 0, 1, 1], [], []>} : vector<16x128xbf16>, vector<128x128xbf16>, vector<16x128xf32> -> vector<16x128xf32>
    %c0_9 = arith.constant 0 : index
    %c0_10 = arith.constant 0 : index
    %12 = vector.load %arg5[%c0_9, %c0_10] : memref<1x128xf32, #tpu.memory_space<vmem>>, vector<1x128xf32>
    %13 = vector.broadcast %12 : vector<1x128xf32> to vector<16x128xf32>
    %14 = arith.addf %11, %13 : vector<16x128xf32>
    %cst_11 = arith.constant 0.000000e+00 : f32
    %15 = vector.broadcast %cst_11 : f32 to vector<16x128xf32>
    %16 = arith.maximumf %14, %15 : vector<16x128xf32>
    %17 = arith.truncf %16 : vector<16x128xf32> to vector<16x128xbf16>
    %c0_12 = arith.constant 0 : index
    %c0_13 = arith.constant 0 : index
    %18 = vector.load %arg6[%c0_12, %c0_13] : memref<128x4xbf16, #tpu.memory_space<vmem>>, vector<128x4xbf16>
    %cst_14 = arith.constant dense<0.000000e+00> : vector<16x4xf32>
    %19 = tpu.matmul %17, %18, %cst_14 {dimension_numbers = #tpu.dot_dimension_numbers<[1], [0], [0], [1], [0, 0, 1, 1], [], []>} : vector<16x128xbf16>, vector<128x4xbf16>, vector<16x4xf32> -> vector<16x4xf32>
    %c0_15 = arith.constant 0 : index
    %c0_16 = arith.constant 0 : index
    %20 = vector.load %arg7[%c0_15, %c0_16] : memref<1x4xf32, #tpu.memory_space<vmem>>, vector<1x4xf32>
    %21 = vector.broadcast %20 : vector<1x4xf32> to vector<16x4xf32>
    %22 = arith.addf %19, %21 : vector<16x4xf32>
    %c0_17 = arith.constant 0 : index
    %c0_18 = arith.constant 0 : index
    %23 = vector.load %arg8[%c0_17, %c0_18] : memref<16x4xf32, #tpu.memory_space<vmem>>, vector<16x4xf32>
    tpu.vector_store %arg8[%c0_17, %c0_18], %22 {strides = array<i32>} : memref<16x4xf32, #tpu.memory_space<vmem>>, vector<16x4xf32>,
    return
  }
  func.func @transform_0(%arg0: i32) -> (i32, i32) {
    %c0_i32 = arith.constant 0 : i32
    %c0_i32_0 = arith.constant 0 : i32
    return %arg0, %c0_i32 : i32, i32
  }
  func.func @transform_1(%arg0: i32) -> (i32, i32) {
    %c0_i32 = arith.constant 0 : i32
    %c0_i32_0 = arith.constant 0 : i32
    %c0_i32_1 = arith.constant 0 : i32
    return %c0_i32, %c0_i32_0 : i32, i32
  }
  func.func @transform_2(%arg0: i32) -> (i32, i32) {
    %c0_i32 = arith.constant 0 : i32
    %c0_i32_0 = arith.constant 0 : i32
    %c0_i32_1 = arith.constant 0 : i32
    return %c0_i32, %c0_i32_0 : i32, i32
  }
  func.func @transform_3(%arg0: i32) -> (i32, i32) {
    %c0_i32 = arith.constant 0 : i32
    %c0_i32_0 = arith.constant 0 : i32
    %c0_i32_1 = arith.constant 0 : i32
    return %c0_i32, %c0_i32_0 : i32, i32
  }
  func.func @transform_4(%arg0: i32) -> (i32, i32) {
    %c0_i32 = arith.constant 0 : i32
    %c0_i32_0 = arith.constant 0 : i32
    %c0_i32_1 = arith.constant 0 : i32
    return %c0_i32, %c0_i32_0 : i32, i32
  }
  func.func @transform_5(%arg0: i32) -> (i32, i32) {
    %c0_i32 = arith.constant 0 : i32
    %c0_i32_0 = arith.constant 0 : i32
    %c0_i32_1 = arith.constant 0 : i32
    return %c0_i32, %c0_i32_0 : i32, i32
  }
  func.func @transform_6(%arg0: i32) -> (i32, i32) {
    %c0_i32 = arith.constant 0 : i32
    %c0_i32_0 = arith.constant 0 : i32
    %c0_i32_1 = arith.constant 0 : i32
    return %c0_i32, %c0_i32_0 : i32, i32
  }
  func.func @transform_7(%arg0: i32) -> (i32, i32) {
    %c0_i32 = arith.constant 0 : i32
    %c0_i32_0 = arith.constant 0 : i32
    return %arg0, %c0_i32 : i32, i32
  }
}

</mosaic_0001>

<bundles_post_ra>
// kernel: _dqn_pallas.1
= control target key start
LH: loop header
LB: loop body
LE: loop exit
PB: predicated region body
PF: predicated region fallthrough
CT: control target
= control target key end

     0   :  { %12 = vsyncpa [#allocation3], 0  ;;  %s695_s0 = inlined_call_operand.vmem [shape: f32[2,25], index: 0, kind: input, shape index: {}]   ;;  %s696_s1 = inlined_call_operand.hbm [shape: bf16[25,128], index: 1, kind: input, shape index: {}]   ;;  %s697_s2 = inlined_call_operand.vmem [shape: f32[1,128], index: 2, kind: input, shape index: {}]   ;;  %s698_s3 = inlined_call_operand.vmem [shape: bf16[128,128], index: 3, kind: input, shape index: {}]   ;;  %s699_s4 = inlined_call_operand.vmem [shape: f32[1,128], index: 4, kind: input, shape index: {}]   ;;  %s700_s5 = inlined_call_operand.vmem [shape: bf16[128,4], index: 5, kind: input, shape index: {}]   ;;  %s701_s6 = inlined_call_operand.vmem [shape: f32[1,4], index: 6, kind: input, shape index: {}]   ;;  %s702_s7 = inlined_call_operand.hbm [shape: f32[2,4], index: 7, kind: output, shape index: {}]  }
   0x1   :  { %13 = vsyncpa [#allocation4], 0  ;;  %s535_s24 = smov [#allocation2]   ;;  %s487_s28 = scalar_lea.hbm %s696_s1, 256 }
   0x2   :  { %s21_s25 = sshll.u32 %s535_s24, 4  ;;  %p488_p0 = scmp.ne.s32.totalorder %s696_s1, %s487_s28  ;;  %s22_s25 = int_to_ptr.vmem [resolvable:$true] %s21_s25 }
   0x3   :  { %p491_p1 = scmp.lt.u32.totalorder %s487_s28, %s696_s1 }
   0x5   :  { %p493_p2 = pnand %p491_p1, %p488_p0 }
   0x7   :  { %496 = shalt.err (!%p493_p2)
}
   0x8   :  { %s497_s10 = scalar_lea.vmem %s22_s25, 256  ;;  %p502_p4 = scmp.lt.s32.totalorder %s22_s25, %s22_s25 }
   0x9   :  { %p498_p3 = scmp.ne.s32.totalorder %s22_s25, %s497_s10  ;;  %p503_p5 = scmp.lt.s32.totalorder %s497_s10, %s497_s10 }
   0xb   :  { %p504_p6 = por %p503_p5, %p502_p4 }
   0xd   :  { %p505_p7 = pnand %p504_p6, %p498_p3 }
   0xf   :  { %508 = shalt.err (!%p505_p7)
}
  0x10   :  { %s536_s11 = smov 64   ;;  %s537_s12 = smov 4  }
  0x11   :  { %27 = dma.hbm_to_vmem [thread:$0]  %s696_s1, 256, %s22_s25, [#allocation3], %s536_s11, %s536_s11, %s537_s12  }
  0x12   :  { %531 = dma.done.wait [#allocation3], 256  }
  0x13   :  { %532 = vsyncadd [#allocation3], 4294967040  ;;  %v538_v0 = vmov 0.0   ;;  %vm71_vm0 = vcmask 1043456   ;;  %vm539_vm1 = vmmov 0   ;;  %vm72_vm2 = vcmask 1044480  }
  0x14   :  { %412 = vmatprep.subr.bf16.mxu0 %v538_v0  ;;  %420 = vmatprep.subr.bf16.mxu1 %v538_v0  ;;  %v540_v1 = vmov 65535   ;;  %v469_v3 = vld [vmem:[#allocation2] sm:$0xff]   ;;  %v470_v5 = vld [vmem:[#allocation2 + $0x8] sm:$0x1f]   ;;  %vm67_vm3 = vcmask 203776   ;;  %v473_v12 = vld [vmem:[%s698_s3 + $0x10] sm:$0xff]  }
  0x15   :  { %416 = vmatprep.mubr.msk.bf16.mxu0 %vm539_vm1, %v538_v0  ;;  %436 = vmatprep.mubr.msk.bf16.mxu1 %vm539_vm1, %v538_v0  ;;  %v73_v2 = vsel %vm71_vm0, 4294967295, %v540_v1  ;;  %v42_v6 = vld [vmem:[%s695_s0] sm:$0xff]  ;;  %v43_v7 = vld [vmem:[%s695_s0 + $0x8] sm:$0xff]  ;;  %v474_v13 = vld [vmem:[%s698_s3 + $0x18] sm:$0xff]   ;;  %vm349_vm4 = vcmask 31744  }
  0x16   :  { %v74_v4 = vsel %vm72_vm2, %v73_v2, 0  ;;  %413 = vmatpush3.bf16.msra.mxu0 %v469_v3  ;;  %v471_v9 = vld [vmem:[%s698_s3] sm:$0xff]   ;;  %v44_v10 = vpack.c.bf16 %v43_v7, %v42_v6  ;;  %v472_v11 = vld [vmem:[%s698_s3 + $0x8] sm:$0xff]   ;;  %v477_v16 = vld [vmem:[%s698_s3 + $0x30] sm:$0xff]  }
  0x17   :  { %414 = vmatprep.subr.bf16.mxu0 %v538_v0  ;;  %v76_v8 = vand.u32 %v470_v5, %v74_v4  ;;  %421 = vmatpush3.bf16.msra.mxu1 %v471_v9  ;;  %v475_v14 = vld [vmem:[%s698_s3 + $0x20] sm:$0xff]   ;;  %v476_v15 = vld [vmem:[%s698_s3 + $0x28] sm:$0xff]   ;;  %v478_v17 = vld [vmem:[%s698_s3 + $0x38] sm:$0xff]  }
  0x18   :  { %422 = vmatprep.subr.bf16.mxu1 %v538_v0  ;;  %v479_v18 = vld [vmem:[%s700_s5] sm:$0xff]   ;;  %v480_v19 = vld [vmem:[%s700_s5 + $0x8] sm:$0xff]   ;;  %v481_v20 = vld [vmem:[%s700_s5 + $0x10] sm:$0xff]  }
  0x19   :  { %v482_v21 = vld [vmem:[%s700_s5 + $0x18] sm:$0xff]   ;;  %v483_v22 = vld [vmem:[%s700_s5 + $0x20] sm:$0xff]   ;;  %v484_v23 = vld [vmem:[%s700_s5 + $0x28] sm:$0xff]  }
  0x1a   :  { %415 = vmatpush3.bf16.msra.mxu0 %v76_v8  ;;  %v369_v24 = vld [vmem:[%s697_s2] ss:$0 sm:$0xff]  ;;  %v485_v34 = vld [vmem:[%s700_s5 + $0x30] sm:$0xff]   ;;  %v486_v35 = vld [vmem:[%s700_s5 + $0x38] sm:$0xff]  }
  0x1b   :  { %440 = vmatprep.subr.bf16.mxu0 %v538_v0  ;;  %423 = vmatpush3.bf16.msra.mxu1 %v472_v11  ;;  %v373_v36 = vld [vmem:[%s699_s4] ss:$0 sm:$0xff] }
  0x1c   :  { %424 = vmatprep.subr.bf16.mxu1 %v538_v0  ;;  %v382_v46 = vld [vmem:[%s701_s6] ss:$0 sm:$0xff] }
  0x1d   :  { %417 = vmatmul.mubr.msk.bf16.vlgmr.msra.gmra.mrb[0].mxu0 %vm67_vm3, %v44_v10 }
  0x1e   :  { %456 = vmatprep.mubr.msk.bf16.mxu0 %vm539_vm1, %v538_v0  ;;  %441 = vmatpush3.bf16.msra.mxu0 %v479_v18 }
  0x1f   :  { %425 = vmatpush3.bf16.msra.mxu1 %v473_v12  ;;  %442 = vmatprep.subr.bf16.mxu0 %v538_v0 }
  0x20   :  { %426 = vmatprep.subr.bf16.mxu1 %v538_v0 }
  0x22   :  { %443 = vmatpush3.bf16.msra.mxu0 %v480_v19 }
  0x23   :  { %427 = vmatpush3.bf16.msra.mxu1 %v474_v13  ;;  %444 = vmatprep.subr.bf16.mxu0 %v538_v0 }
  0x24   :  { %428 = vmatprep.subr.bf16.mxu1 %v538_v0 }
  0x26   :  { %445 = vmatpush3.bf16.msra.mxu0 %v481_v20 }
  0x27   :  { %429 = vmatpush3.bf16.msra.mxu1 %v475_v14  ;;  %446 = vmatprep.subr.bf16.mxu0 %v538_v0 }
  0x28   :  { %430 = vmatprep.subr.bf16.mxu1 %v538_v0 }
  0x2a   :  { %447 = vmatpush3.bf16.msra.mxu0 %v482_v21 }
  0x2b   :  { %431 = vmatpush3.bf16.msra.mxu1 %v476_v15  ;;  %448 = vmatprep.subr.bf16.mxu0 %v538_v0 }
  0x2c   :  { %432 = vmatprep.subr.bf16.mxu1 %v538_v0 }
  0x2e   :  { %449 = vmatpush3.bf16.msra.mxu0 %v483_v22 }
  0x2f   :  { %433 = vmatpush3.bf16.msra.mxu1 %v477_v16  ;;  %450 = vmatprep.subr.bf16.mxu0 %v538_v0 }
  0x30   :  { %434 = vmatprep.subr.bf16.mxu1 %v538_v0 }
  0x32   :  { %451 = vmatpush3.bf16.msra.mxu0 %v484_v23 }
  0x33   :  { %435 = vmatpush3.bf16.msra.mxu1 %v478_v17  ;;  %452 = vmatprep.subr.bf16.mxu0 %v538_v0 }
  0x36   :  { %453 = vmatpush3.bf16.msra.mxu0 %v485_v34 }
  0x37   :  { %454 = vmatprep.subr.bf16.mxu0 %v538_v0 }
  0x3a   :  { %455 = vmatpush3.bf16.msra.mxu0 %v486_v35 }
  0xf0   :  { %v112_v25 = vpop.f32.mrb[0].mxu0 }
  0xf1   :  { %v113_v26 = vadd.f32 %v369_v24, %v112_v25  ;;  %v418_v27 = vpop.f32.mrb[1].mxu0 }
  0xf2   :  { %v115_v28 = vpop.f32.mrb[2].mxu0 }
  0xf3   :  { %v116_v29 = vadd.f32 %v369_v24, %v115_v28  ;;  %v419_v30 = vpop.f32.mrb[3].mxu0  ;;  %v119_v31 = vmax.f32 %v113_v26, 0.0 }
  0xf5   :  { %v120_v32 = vmax.f32 %v116_v29, 0.0 }
  0xf7   :  { %v121_v33 = vpack.c.bf16 %v120_v32, %v119_v31 }
  0xf9   :  { %437 = vmatmul.mubr.bf16.vlgmr.msra.gmra.mrb[0].mxu1 %v121_v33 }
 0x1cc   :  { %v227_v37 = vpop.f32.mrb[0].mxu1 }
 0x1cd   :  { %v228_v38 = vadd.f32 %v373_v36, %v227_v37  ;;  %v438_v39 = vpop.f32.mrb[1].mxu1 }
 0x1ce   :  { %v230_v40 = vpop.f32.mrb[2].mxu1 }
 0x1cf   :  { %v231_v41 = vadd.f32 %v373_v36, %v230_v40  ;;  %v439_v42 = vpop.f32.mrb[3].mxu1  ;;  %v234_v43 = vmax.f32 %v228_v38, 0.0 }
 0x1d1   :  { %v235_v44 = vmax.f32 %v231_v41, 0.0 }
 0x1d3   :  { %v236_v45 = vpack.c.bf16 %v235_v44, %v234_v43 }
 0x1d5   :  { %457 = vmatmul.mubr.bf16.vlgmr.msra.gmra.mrb[4].mxu0 %v236_v45 }
 0x2a8   :  { %v342_v47 = vpop.f32.mrb[4].mxu0 }
 0x2a9   :  { %v343_v48 = vadd.f32 %v382_v46, %v342_v47  ;;  %v458_v49 = vpop.f32.mrb[5].mxu0 }
 0x2aa   :  { %v345_v50 = vpop.f32.mrb[6].mxu0 }
 0x2ab   :  { %350 = vst.msk [vmem:[#allocation5] sm:$0xff] %vm349_vm4, %v343_v48  ;;  %v346_v51 = vadd.f32 %v382_v46, %v345_v50  ;;  %v459_v52 = vpop.f32.mrb[7].mxu0 }
 0x2ad   :  { %351 = vst.msk [vmem:[#allocation5 + $0x8] sm:$0xff] %vm349_vm4, %v346_v51 }
 0x2ae   :  { %356 = vsyncadd [#allocation4], 224  ;;  %s541_s4 = smov [#allocation5]  }
 0x2af   :  { %s357_s5 = sshll.u32 %s541_s4, 4  ;;  %s358_s5 = int_to_ptr.vmem [resolvable:$true] %s357_s5 }
 0x2b0   :  { %s509_s28 = scalar_lea.vmem %s358_s5, 32  ;;  %s513_s29 = scalar_lea.vmem %s358_s5, 256 }
 0x2b1   :  { %p510_p8 = scmp.ne.s32.totalorder %s358_s5, %s509_s28  ;;  %p514_p9 = scmp.lt.s32.totalorder %s358_s5, %s358_s5 }
 0x2b2   :  { %p515_p10 = scmp.lt.s32.totalorder %s513_s29, %s509_s28 }
 0x2b4   :  { %p516_p11 = por %p515_p10, %p514_p9 }
 0x2b6   :  { %p517_p12 = pnand %p516_p11, %p510_p8 }
 0x2b8   :  { %520 = shalt.err (!%p517_p12)
}
 0x2b9   :  { %s521_s8 = scalar_lea.hbm %s702_s7, 32 }
 0x2ba   :  { %p522_p13 = scmp.ne.s32.totalorder %s702_s7, %s521_s8  ;;  %p525_p0 = scmp.lt.u32.totalorder %s521_s8, %s702_s7 }
 0x2bc   :  { %p527_p1 = pnand %p525_p0, %p522_p13 }
 0x2be   :  { %530 = shalt.err (!%p527_p1)
}
 0x2bf   :  { %s542_s13 = smov 32   ;;  %s543_s14 = smov 2  }
 0x2c0   :  { %363 = dma.vmem_to_hbm [thread:$0]  %s358_s5, 32, %s702_s7, [#allocation4], %s542_s13, %s542_s13, %s543_s14  }
 0x2c1   :  { %533 = dma.done.wait [#allocation4], 256  }
 0x2c2   :  { %534 = vsyncadd [#allocation4], 4294967040 }
 0x2c3   :  { %367 = vsyncpa [#allocation3], 1 }
 0x2c4   :  { %368 = vsyncpa [#allocation4], 1 }

</bundles_post_ra>
